<compile_context>
chip_gen: v5e
topology: v5e:2x2
jax: 0.10.0
libtpu: 0.0.40
codegen_flags: <defaults>
</compile_context>

<pallas_src>
import math

import jax
import jax.numpy as jnp
import numpy as np
from jax.experimental import pallas as pl
from jax.experimental.pallas import tpu as pltpu


# ------------------------------ fused kernel --------------------------------

def _fused_mha_kernel(x_ref, w_in_ref, b_in_ref, w_o_ref, b_o_ref, o_ref):
    # x_ref:    (B, S, D_in)     tokens already in the module's quirky (B,S) order
    # w_in_ref: (H, D_in, 3*hd)  per-head [q|k|v] projection columns (conn+qkv fused)
    # b_in_ref: (H, 1, 3*hd)
    # w_o_ref:  (H, hd, E)       per-head row-slab of o_proj weight (pre-transposed)
    # b_o_ref:  (1, E)
    # o_ref:    (S, B*E)         row-major identical to the module's (S, B, E) output
    B, S, D = x_ref.shape
    H, _, F3 = w_in_ref.shape
    hd = F3 // 3
    E = b_o_ref.shape[-1]
    n = H * B
    scale = 1.0 / math.sqrt(hd)

    x = x_ref[...]                                                    # (B, S, D)

    # Build head-batched operands with a single *leading* batch dim n = h*B + b.
    # The broadcasts are tiny VMEM copies; this avoids any in-kernel transpose
    # (heads never have to migrate from lanes to a leading dim).
    x_n = jnp.broadcast_to(x[None], (H, B, S, D)).reshape(n, S, D)
    w_n = jnp.broadcast_to(w_in_ref[...][:, None], (H, B, D, F3)).reshape(n, D, F3)
    b_n = jnp.broadcast_to(b_in_ref[...][:, None], (H, B, 1, F3)).reshape(n, 1, F3)
    wo_n = jnp.broadcast_to(w_o_ref[...][:, None], (H, B, hd, E)).reshape(n, hd, E)

    # QKV projection for every (head, batch) pair in one batched matmul.
    qkv = jnp.einsum("nsd,ndf->nsf", x_n, w_n,
                     preferred_element_type=jnp.float32) + b_n        # (n, S, 3hd)
    q = qkv[..., 0 * hd:1 * hd] * scale     # softmax scale folded into q (S*hd work)
    k = qkv[..., 1 * hd:2 * hd]
    v = qkv[..., 2 * hd:3 * hd]

    # All heads/batches of attention in single batched einsums (no Python unroll
    # of matmuls, so no H simultaneous (S,S) live intermediates).
    logits = jnp.einsum("nsd,ntd->nst", q, k,
                        preferred_element_type=jnp.float32)           # (n, S, S)
    m = jnp.max(logits, axis=-1, keepdims=True)
    p = jnp.exp(logits - m)
    denom = jnp.sum(p, axis=-1, keepdims=True)
    attn = p * pl.reciprocal(denom, approx=False)   # exact: keeps 1e-5 vs f32 ref
    vals = jnp.einsum("nst,ntd->nsd", attn, v,
                      preferred_element_type=jnp.float32)             # (n, S, hd)

    # Output projection, batched per (head, batch); then sum the head
    # contributions (H-1 elementwise adds of (B,S,E) — pure VALU, no matmuls).
    contrib = jnp.einsum("nsd,nde->nse", vals, wo_n,
                         preferred_element_type=jnp.float32)          # (n, S, E)
    o = contrib[0:B]
    for h in range(1, H):
        o = o + contrib[h * B:(h + 1) * B]                            # (B, S, E)
    o = o + b_o_ref[...]

    # Emit the module's (S, B, E) output directly: an (S, B*E) row-major slab is
    # the same memory layout, so the wrapper reshape is free (no transpose op).
    o_ref[...] = jnp.concatenate([o[b] for b in range(B)], axis=-1)   # (S, B*E)


# ------------------------------ forward wrapper ------------------------------

def multihead_attention_mod_forward(x, prep):
    """Pallas implementation of MultiheadAttention_mod.forward (mask=None).

    x: (S, B, D_in) f32.  prep: host-prepared weights from prepare_params().
    Returns (S, B, embed_dim).
    """
    S, B, D_in = x.shape
    H, _, F3 = prep["w_in"].shape
    hd = F3 // 3
    E = prep["b_o"].shape[-1]

    # The module's contiguous (S,B,.) -> (B,S,.) reshape (NOT a permute): since
    # the projections are per-token, reshaping x first is mathematically
    # identical and is a pure metadata reshape.
    x_btd = x.reshape(B, S, D_in)

    out = pl.pallas_call(
        _fused_mha_kernel,
        out_shape=jax.ShapeDtypeStruct((S, B * E), jnp.float32),
        grid=(1,),                     # single step: no per-batch grid overhead
        in_specs=[
            pl.BlockSpec((B, S, D_in), lambda i: (0, 0, 0)),
            pl.BlockSpec((H, D_in, F3), lambda i: (0, 0, 0)),
            pl.BlockSpec((H, 1, F3), lambda i: (0, 0, 0)),
            pl.BlockSpec((H, hd, E), lambda i: (0, 0, 0)),
            pl.BlockSpec((1, E), lambda i: (0, 0)),
        ],
        out_specs=pl.BlockSpec((S, B * E), lambda i: (0, 0)),
        compiler_params=pltpu.CompilerParams(
            dimension_semantics=("arbitrary",),
            vmem_limit_bytes=32 * 1024 * 1024,   # safe on v5e/v6e/v7x at this size
        ),
    )(x_btd, prep["w_in"], prep["b_in"], prep["w_o"], prep["b_o"])

    # (S, B*E) -> (S, B, E): layout-preserving, metadata-only reshape.
    return out.reshape(S, B, E)


# --------------------------- host-side weight prep ---------------------------

def prepare_params(params, num_heads):
    """One-time weight fusion: concat(connectivity, qkv_proj) rows (which already
    follow the module's per-head [q|k|v] slab order after its quirky reshape),
    split per head, and pre-transpose to (in, out) layout for the kernel's
    head-batched matmuls."""
    H = num_heads
    hd = params["w_conn"].shape[0]
    D_in = params["w_conn"].shape[1]
    E = params["w_o"].shape[0]

    w_cat = jnp.concatenate([params["w_conn"], params["w_qkv"]], axis=0)   # (3EH, D_in)
    b_cat = jnp.concatenate([params["b_conn"], params["b_qkv"]], axis=0)   # (3EH,)

    return {
        "w_in": jnp.transpose(w_cat.reshape(H, 3 * hd, D_in), (0, 2, 1)),  # (H, D_in, 3hd)
        "b_in": b_cat.reshape(H, 1, 3 * hd),
        "w_o": jnp.transpose(params["w_o"]).reshape(H, hd, E),             # (H, hd, E)
        "b_o": params["b_o"].reshape(1, E),
    }


# ---------------------------------- reference ---------------------------------

def reference_forward(x, params, num_heads):
    S, B, D_in = x.shape
    head_dim = params["w_conn"].shape[0]
    EH = head_dim * num_heads
    qkv_lin = x @ params["w_qkv"].T + params["b_qkv"]
    conn = x @ params["w_conn"].T + params["b_conn"]
    qkv = jnp.concatenate([conn, qkv_lin], axis=2)
    qkv = qkv.reshape(B, S, num_heads, 3 * head_dim).transpose(0, 2, 1, 3)
    q, k, v = jnp.split(qkv, 3, axis=-1)
    logits = jnp.einsum("bhsd,bhtd->bhst", q, k) / math.sqrt(head_dim)
    attn = jax.nn.softmax(logits, axis=-1)
    vals = jnp.einsum("bhst,bhtd->bhsd", attn, v)
    vals = vals.transpose(0, 2, 1, 3).reshape(B, S, EH)
    o = vals @ params["w_o"].T + params["b_o"]
    return o.transpose(1, 0, 2)


# ---------------------------------- param init --------------------------------

def xavier_uniform(key, shape):
    fan_out, fan_in = shape
    bound = math.sqrt(6.0 / (fan_in + fan_out))
    return jax.random.uniform(key, shape, jnp.float32, -bound, bound)


def init_params(key, input_dim, embed_dim, num_heads):
    head_dim = embed_dim                  # self.head_dim == embed_dim ctor arg
    EH = embed_dim * num_heads            # self.embed_dim
    k_qkv, k_o, k_fix, k_cb = jax.random.split(key, 4)
    return {
        # qkv_proj: Linear(input_dim, 3*EH - head_dim), xavier, bias 0
        "w_qkv": xavier_uniform(k_qkv, (3 * EH - head_dim, input_dim)),
        "b_qkv": jnp.zeros((3 * EH - head_dim,), jnp.float32),
        # connectivity: weight = fixed_matrix (head_dim, input_dim), bias frozen
        "w_conn": jax.random.normal(k_fix, (head_dim, input_dim), jnp.float32) * 0.1,
        "b_conn": jax.random.uniform(k_cb, (head_dim,), jnp.float32,
                                     -1.0 / math.sqrt(input_dim),
                                     1.0 / math.sqrt(input_dim)),
        # o_proj: Linear(EH, embed_dim), xavier, bias 0
        "w_o": xavier_uniform(k_o, (embed_dim, EH)),
        "b_o": jnp.zeros((embed_dim,), jnp.float32),
    }


# ------------------------------------- main -----------------------------------

if __name__ == "__main__":
    key = jax.random.PRNGKey(0)
    k_x, k_p = jax.random.split(key)

    seq_len, batch, input_dim = 8, 2, 16
    embed_dim, num_heads = 8, 4          # head_dim == embed_dim == 8, EH == 32

    x = jax.random.normal(k_x, (seq_len, batch, input_dim), jnp.float32)
    params = init_params(k_p, input_dim, embed_dim, num_heads)
    prep = prepare_params(params, num_heads)     # hoisted: done once, not per call

    fwd = jax.jit(multihead_attention_mod_forward)
    out = jax.block_until_ready(fwd(x, prep))

    ref = reference_forward(x, params, num_heads)
    assert out.shape == (seq_len, batch, embed_dim), out.shape
    np.testing.assert_allclose(np.asarray(out), np.asarray(ref),
                               rtol=1e-5, atol=1e-5)
    print("KERNEL_OK")
</pallas_src>

<mosaic_0001>
module attributes {stable_mosaic.version = 11 : i64} {
  func.func @_fused_mha_kernel(%arg0: i32, %arg1: memref<2x8x16xf32, #tpu.memory_space<vmem>>, %arg2: memref<4x16x24xf32, #tpu.memory_space<vmem>>, %arg3: memref<4x1x24xf32, #tpu.memory_space<vmem>>, %arg4: memref<4x8x8xf32, #tpu.memory_space<vmem>>, %arg5: memref<1x8xf32, #tpu.memory_space<vmem>>, %arg6: memref<8x16xf32, #tpu.memory_space<vmem>>) attributes {dimension_semantics = [#tpu.dimension_semantics<arbitrary>], iteration_bounds = array<i64: 1>, scalar_prefetch = 0 : i64, scratch_operands = 0 : i64, tpu.core_type = #tpu.core_type<tc>, window_params = [{pipeline_mode = #tpu.pipeline_mode<synchronous>, transform_indices = @transform_0, window_bounds = array<i64: 2, 8, 16>}, {pipeline_mode = #tpu.pipeline_mode<synchronous>, transform_indices = @transform_1, window_bounds = array<i64: 4, 16, 24>}, {pipeline_mode = #tpu.pipeline_mode<synchronous>, transform_indices = @transform_2, window_bounds = array<i64: 4, 1, 24>}, {pipeline_mode = #tpu.pipeline_mode<synchronous>, transform_indices = @transform_3, window_bounds = array<i64: 4, 8, 8>}, {pipeline_mode = #tpu.pipeline_mode<synchronous>, transform_indices = @transform_4, window_bounds = array<i64: 1, 8>}, {pipeline_mode = #tpu.pipeline_mode<synchronous>, transform_indices = @transform_5, window_bounds = array<i64: 8, 16>}]} {
    %c0 = arith.constant 0 : index
    %c0_0 = arith.constant 0 : index
    %c0_1 = arith.constant 0 : index
    %0 = vector.load %arg1[%c0, %c0_0, %c0_1] : memref<2x8x16xf32, #tpu.memory_space<vmem>>, vector<2x8x16xf32>
    %1 = vector.shape_cast %0 : vector<2x8x16xf32> to vector<1x2x8x16xf32>
    %2 = vector.shape_cast %1 : vector<1x2x8x16xf32> to vector<1x2x8x16xf32>
    %3 = vector.broadcast %2 : vector<1x2x8x16xf32> to vector<4x2x8x16xf32>
    %4 = vector.shape_cast %3 : vector<4x2x8x16xf32> to vector<8x8x16xf32>
    %c0_2 = arith.constant 0 : index
    %c0_3 = arith.constant 0 : index
    %c0_4 = arith.constant 0 : index
    %5 = vector.load %arg2[%c0_2, %c0_3, %c0_4] : memref<4x16x24xf32, #tpu.memory_space<vmem>>, vector<4x16x24xf32>
    %6 = vector.shape_cast %5 : vector<4x16x24xf32> to vector<4x1x16x24xf32>
    %7 = vector.shape_cast %6 : vector<4x1x16x24xf32> to vector<4x1x16x24xf32>
    %8 = vector.broadcast %7 : vector<4x1x16x24xf32> to vector<4x2x16x24xf32>
    %9 = vector.shape_cast %8 : vector<4x2x16x24xf32> to vector<8x16x24xf32>
    %c0_5 = arith.constant 0 : index
    %c0_6 = arith.constant 0 : index
    %c0_7 = arith.constant 0 : index
    %10 = vector.load %arg3[%c0_5, %c0_6, %c0_7] : memref<4x1x24xf32, #tpu.memory_space<vmem>>, vector<4x1x24xf32>
    %11 = vector.shape_cast %10 : vector<4x1x24xf32> to vector<4x1x1x24xf32>
    %12 = vector.shape_cast %11 : vector<4x1x1x24xf32> to vector<4x1x1x24xf32>
    %13 = vector.broadcast %12 : vector<4x1x1x24xf32> to vector<4x2x1x24xf32>
    %14 = vector.shape_cast %13 : vector<4x2x1x24xf32> to vector<8x1x24xf32>
    %c0_8 = arith.constant 0 : index
    %c0_9 = arith.constant 0 : index
    %c0_10 = arith.constant 0 : index
    %15 = vector.load %arg4[%c0_8, %c0_9, %c0_10] : memref<4x8x8xf32, #tpu.memory_space<vmem>>, vector<4x8x8xf32>
    %16 = vector.shape_cast %15 : vector<4x8x8xf32> to vector<4x1x8x8xf32>
    %17 = vector.shape_cast %16 : vector<4x1x8x8xf32> to vector<4x1x8x8xf32>
    %18 = vector.broadcast %17 : vector<4x1x8x8xf32> to vector<4x2x8x8xf32>
    %19 = vector.shape_cast %18 : vector<4x2x8x8xf32> to vector<8x8x8xf32>
    "tpu.trace_start"() <{level = 10 : i32, message = "nsd,ndf->nsf"}> : () -> ()
    %cst = arith.constant dense<0.000000e+00> : vector<8x8x24xf32>
    %20 = tpu.matmul %4, %9, %cst {dimension_numbers = #tpu.dot_dimension_numbers<[2], [1], [1], [2], [0, 0, 0, 1, 1, 2], [0], [0]>} : vector<8x8x16xf32>, vector<8x16x24xf32>, vector<8x8x24xf32> -> vector<8x8x24xf32>
    "tpu.trace_stop"() : () -> ()
    %21 = vector.broadcast %14 : vector<8x1x24xf32> to vector<8x8x24xf32>
    %22 = arith.addf %20, %21 : vector<8x8x24xf32>
    %23 = vector.extract_strided_slice %22 {offsets = [0, 0, 0], sizes = [8, 8, 8], strides = [1, 1, 1]} : vector<8x8x24xf32> to vector<8x8x8xf32>
    %cst_11 = arith.constant 0.353553385 : f32
    %24 = vector.broadcast %cst_11 : f32 to vector<8x8x8xf32>
    %25 = arith.mulf %23, %24 : vector<8x8x8xf32>
    %26 = vector.extract_strided_slice %22 {offsets = [0, 0, 8], sizes = [8, 8, 8], strides = [1, 1, 1]} : vector<8x8x24xf32> to vector<8x8x8xf32>
    %27 = vector.extract_strided_slice %22 {offsets = [0, 0, 16], sizes = [8, 8, 8], strides = [1, 1, 1]} : vector<8x8x24xf32> to vector<8x8x8xf32>
    "tpu.trace_start"() <{level = 10 : i32, message = "nsd,ntd->nst"}> : () -> ()
    %cst_12 = arith.constant dense<0.000000e+00> : vector<8x8x8xf32>
    %28 = tpu.matmul %25, %26, %cst_12 {dimension_numbers = #tpu.dot_dimension_numbers<[2], [2], [1], [1], [0, 0, 0, 1, 1, 1], [0], [0]>} : vector<8x8x8xf32>, vector<8x8x8xf32>, vector<8x8x8xf32> -> vector<8x8x8xf32>
    "tpu.trace_stop"() : () -> ()
    %cst_13 = arith.constant dense<0xFF800000> : vector<8x8xf32>
    %29 = vector.multi_reduction <maximumf>, %28, %cst_13 [2] : vector<8x8x8xf32> to vector<8x8xf32>
    %30 = vector.shape_cast %29 : vector<8x8xf32> to vector<8x8x1xf32>
    %31 = vector.broadcast %30 : vector<8x8x1xf32> to vector<8x8x8xf32>
    %32 = arith.subf %28, %31 : vector<8x8x8xf32>
    %33 = math.exp %32 : vector<8x8x8xf32>
    %cst_14 = arith.constant dense<0.000000e+00> : vector<8x8xf32>
    %34 = vector.multi_reduction <add>, %33, %cst_14 [2] : vector<8x8x8xf32> to vector<8x8xf32>
    %35 = vector.shape_cast %34 : vector<8x8xf32> to vector<8x8x1xf32>
    %36 = tpu.reciprocal %35 : vector<8x8x1xf32> -> vector<8x8x1xf32>
    %37 = vector.broadcast %36 : vector<8x8x1xf32> to vector<8x8x8xf32>
    %38 = arith.mulf %33, %37 : vector<8x8x8xf32>
    "tpu.trace_start"() <{level = 10 : i32, message = "nst,ntd->nsd"}> : () -> ()
    %cst_15 = arith.constant dense<0.000000e+00> : vector<8x8x8xf32>
    %39 = tpu.matmul %38, %27, %cst_15 {dimension_numbers = #tpu.dot_dimension_numbers<[2], [1], [1], [2], [0, 0, 0, 1, 1, 2], [0], [0]>} : vector<8x8x8xf32>, vector<8x8x8xf32>, vector<8x8x8xf32> -> vector<8x8x8xf32>
    "tpu.trace_stop"() : () -> ()
    "tpu.trace_start"() <{level = 10 : i32, message = "nsd,nde->nse"}> : () -> ()
    %cst_16 = arith.constant dense<0.000000e+00> : vector<8x8x8xf32>
    %40 = tpu.matmul %39, %19, %cst_16 {dimension_numbers = #tpu.dot_dimension_numbers<[2], [1], [1], [2], [0, 0, 0, 1, 1, 2], [0], [0]>} : vector<8x8x8xf32>, vector<8x8x8xf32>, vector<8x8x8xf32> -> vector<8x8x8xf32>
    "tpu.trace_stop"() : () -> ()
    %41 = vector.extract_strided_slice %40 {offsets = [0, 0, 0], sizes = [2, 8, 8], strides = [1, 1, 1]} : vector<8x8x8xf32> to vector<2x8x8xf32>
    %42 = vector.extract_strided_slice %40 {offsets = [2, 0, 0], sizes = [2, 8, 8], strides = [1, 1, 1]} : vector<8x8x8xf32> to vector<2x8x8xf32>
    %43 = arith.addf %41, %42 : vector<2x8x8xf32>
    %44 = vector.extract_strided_slice %40 {offsets = [4, 0, 0], sizes = [2, 8, 8], strides = [1, 1, 1]} : vector<8x8x8xf32> to vector<2x8x8xf32>
    %45 = arith.addf %43, %44 : vector<2x8x8xf32>
    %46 = vector.extract_strided_slice %40 {offsets = [6, 0, 0], sizes = [2, 8, 8], strides = [1, 1, 1]} : vector<8x8x8xf32> to vector<2x8x8xf32>
    %47 = arith.addf %45, %46 : vector<2x8x8xf32>
    %c0_17 = arith.constant 0 : index
    %c0_18 = arith.constant 0 : index
    %48 = vector.load %arg5[%c0_17, %c0_18] : memref<1x8xf32, #tpu.memory_space<vmem>>, vector<1x8xf32>
    %49 = vector.shape_cast %48 : vector<1x8xf32> to vector<1x1x8xf32>
    %50 = vector.broadcast %49 : vector<1x1x8xf32> to vector<2x8x8xf32>
    %51 = arith.addf %47, %50 : vector<2x8x8xf32>
    %52 = vector.extract_strided_slice %51 {offsets = [0, 0, 0], sizes = [1, 8, 8], strides = [1, 1, 1]} : vector<2x8x8xf32> to vector<1x8x8xf32>
    %53 = vector.shape_cast %52 : vector<1x8x8xf32> to vector<8x8xf32>
    %54 = vector.extract_strided_slice %51 {offsets = [1, 0, 0], sizes = [1, 8, 8], strides = [1, 1, 1]} : vector<2x8x8xf32> to vector<1x8x8xf32>
    %55 = vector.shape_cast %54 : vector<1x8x8xf32> to vector<8x8xf32>
    %56 = tpu.concatenate %53, %55 in 1 : vector<8x8xf32>, vector<8x8xf32> -> vector<8x16xf32>
    %c0_19 = arith.constant 0 : index
    %c0_20 = arith.constant 0 : index
    %57 = vector.load %arg6[%c0_19, %c0_20] : memref<8x16xf32, #tpu.memory_space<vmem>>, vector<8x16xf32>
    tpu.vector_store %arg6[%c0_19, %c0_20], %56 {strides = array<i32>} : memref<8x16xf32, #tpu.memory_space<vmem>>, vector<8x16xf32>,
    return
  }
  func.func @transform_0(%arg0: i32) -> (i32, i32, i32) {
    %c0_i32 = arith.constant 0 : i32
    %c0_i32_0 = arith.constant 0 : i32
    %c0_i32_1 = arith.constant 0 : i32
    %c0_i32_2 = arith.constant 0 : i32
    return %c0_i32, %c0_i32_0, %c0_i32_1 : i32, i32, i32
  }
  func.func @transform_1(%arg0: i32) -> (i32, i32, i32) {
    %c0_i32 = arith.constant 0 : i32
    %c0_i32_0 = arith.constant 0 : i32
    %c0_i32_1 = arith.constant 0 : i32
    %c0_i32_2 = arith.constant 0 : i32
    return %c0_i32, %c0_i32_0, %c0_i32_1 : i32, i32, i32
  }
  func.func @transform_2(%arg0: i32) -> (i32, i32, i32) {
    %c0_i32 = arith.constant 0 : i32
    %c0_i32_0 = arith.constant 0 : i32
    %c0_i32_1 = arith.constant 0 : i32
    %c0_i32_2 = arith.constant 0 : i32
    return %c0_i32, %c0_i32_0, %c0_i32_1 : i32, i32, i32
  }
  func.func @transform_3(%arg0: i32) -> (i32, i32, i32) {
    %c0_i32 = arith.constant 0 : i32
    %c0_i32_0 = arith.constant 0 : i32
    %c0_i32_1 = arith.constant 0 : i32
    %c0_i32_2 = arith.constant 0 : i32
    return %c0_i32, %c0_i32_0, %c0_i32_1 : i32, i32, i32
  }
  func.func @transform_4(%arg0: i32) -> (i32, i32) {
    %c0_i32 = arith.constant 0 : i32
    %c0_i32_0 = arith.constant 0 : i32
    %c0_i32_1 = arith.constant 0 : i32
    return %c0_i32, %c0_i32_0 : i32, i32
  }
  func.func @transform_5(%arg0: i32) -> (i32, i32) {
    %c0_i32 = arith.constant 0 : i32
    %c0_i32_0 = arith.constant 0 : i32
    %c0_i32_1 = arith.constant 0 : i32
    return %c0_i32, %c0_i32_0 : i32, i32
  }
}

</mosaic_0001>

<bundles_post_ra>
// kernel: multihead_attention_mod_forward.1
= control target key start
LH: loop header
LB: loop body
LE: loop exit
PB: predicated region body
PF: predicated region fallthrough
CT: control target
= control target key end

     0   :  { %10 = vsyncpa [#allocation3], 0  ;;  %s1557_s0 = inlined_call_operand.hbm [shape: f32[2,8,16], index: 0, kind: input, shape index: {}]   ;;  %s1558_s1 = inlined_call_operand.hbm [shape: f32[4,16,24], index: 1, kind: input, shape index: {}]   ;;  %s1559_s2 = inlined_call_operand.hbm [shape: f32[4,1,24], index: 2, kind: input, shape index: {}]   ;;  %s1560_s3 = inlined_call_operand.hbm [shape: f32[4,8,8], index: 3, kind: input, shape index: {}]   ;;  %s1561_s4 = inlined_call_operand.vmem [shape: f32[1,8], index: 4, kind: input, shape index: {}]   ;;  %s1562_s5 = inlined_call_operand.vmem [shape: f32[8,16], index: 5, kind: output, shape index: {}]  }
   0x1   :  { %11 = vsyncpa [#allocation5], 0 }
   0x2   :  { %12 = vsyncpa [#allocation8], 0  ;;  %s30_s20 = sshll.u32 %s1558_s1, 4  ;;  %s1326_s21 = smov [#allocation4]   ;;  %s31_s20 = int_to_ptr.hbm [resolvable:$true] %s30_s20 }
   0x3   :  { %s32_s22 = sshll.u32 %s1326_s21, 4  ;;  %s17_s25 = sshll.u32 %s1557_s0, 4  ;;  %s33_s22 = int_to_ptr.vmem [resolvable:$true] %s32_s22  ;;  %s18_s25 = int_to_ptr.hbm [resolvable:$true] %s17_s25 }
   0x4   :  { %s1327_s26 = smov 128   ;;  %s1328_s27 = smov 8  }
   0x5   :  { %38 = dma.hbm_to_vmem [thread:$0]  %s31_s20, 1024, %s33_s22, [#allocation5], %s1327_s26, %s1327_s26, %s1328_s27  }
   0x6   :  { %s1329_s28 = smov [#allocation2]   ;;  %s43_s7 = sshll.u32 %s1559_s2, 4  ;;  %s44_s7 = int_to_ptr.hbm [resolvable:$true] %s43_s7 }
   0x7   :  { %s19_s29 = sshll.u32 %s1329_s28, 4  ;;  %s1330_s1 = smov [#allocation6]   ;;  %s20_s29 = int_to_ptr.vmem [resolvable:$true] %s19_s29 }
   0x8   :  { %25 = dma.hbm_to_vmem [thread:$0]  %s18_s25, 256, %s20_s29, [#allocation3], %s1327_s26, %s1327_s26, %s1328_s27  }
   0x9   :  { %s45_s8 = sshll.u32 %s1330_s1, 4  ;;  %s56_s10 = sshll.u32 %s1560_s3, 4  ;;  %s46_s8 = int_to_ptr.vmem [resolvable:$true] %s45_s8  ;;  %s57_s10 = int_to_ptr.hbm [resolvable:$true] %s56_s10 }
   0xa   :  { %s1331_s11 = smov 16   ;;  %s1332_s12 = smov 1  }
   0xb   :  { %51 = dma.hbm_to_vmem [thread:$0]  %s44_s7, 64, %s46_s8, [#allocation5], %s1331_s11, %s1331_s11, %s1332_s12  }
   0xc   :  { %s1333_s13 = smov [#allocation7]  }
   0xd   :  { %s58_s14 = sshll.u32 %s1333_s13, 4  ;;  %s59_s14 = int_to_ptr.vmem [resolvable:$true] %s58_s14 }
   0xe   :  { %64 = dma.hbm_to_vmem [thread:$0]  %s57_s10, 512, %s59_s14, [#allocation8], %s1327_s26, %s1327_s26, %s1328_s27  }
   0xf   :  { %1320 = dma.done.wait [#allocation3], 256  }
  0x10   :  { %1321 = vsyncadd [#allocation3], 4294967040 }
  0x11   :  { %1322 = dma.done.wait [#allocation5], 1088  }
  0x12   :  { %1323 = vsyncadd [#allocation5], 4294966208 }
  0x13   :  { %1324 = dma.done.wait [#allocation8], 512  }
  0x14   :  { %1325 = vsyncadd [#allocation8], 4294966784  ;;  %v86_v0 = vld [vmem:[#allocation4 + $0x8] sm:$0xff]  ;;  %v88_v1 = vld [vmem:[#allocation4 + $0x18] sm:$0xff]  ;;  %vm113_vm0 = vcmask 130048   ;;  %s1334_s2 = smov 120  }
  0x15   :  { %v85_v2 = vld [vmem:[#allocation4] sm:$0xff]  ;;  %154 = vmatpush.msra.mxu1 %v86_v0  ;;  %194 = vmatpush.msra.mxu3 %v88_v1  ;;  %v87_v3 = vld [vmem:[#allocation4 + $0x10] sm:$0xff]  ;;  %v84_v4 = vld [vmem:[#allocation2 + $0x8] sm:$0xff]  ;;  %vm291_vm1 = vcmask 64512   ;;  %s1335_s3 = smov 112  }
  0x16   :  { %v90_v5 = vld [vmem:[#allocation4 + $0x28] sm:$0xff]  ;;  %v92_v6 = vld [vmem:[#allocation4 + $0x38] sm:$0xff]  ;;  %131 = vmatpush.msra.mxu0 %v86_v0  ;;  %174 = vmatpush.msra.mxu2 %v88_v1  ;;  %v89_v7 = vld [vmem:[#allocation4 + $0x20] sm:$0xff] }
  0x17   :  { %155 = vmatpush.msra.mxu1 %v85_v2  ;;  %195 = vmatpush.msra.mxu3 %v87_v3  ;;  %v91_v8 = vld [vmem:[#allocation4 + $0x30] sm:$0xff]  ;;  %v1187_v10 = vld [vmem:[#allocation6] ss:$0 sm:$0xff]  ;;  %v1188_v13 = vld [vmem:[#allocation6 + $0x1] ss:$0 sm:$0xff] }
  0x18   :  { %1123 = vmatmul.msk.f32.vlgmr.msra.gmra.mxu1 %vm113_vm0, %v84_v4  ;;  %1125 = vmatmul.msk.f32.vlgmr.msra.gmra.mxu3 %vm113_vm0, %v84_v4  ;;  %v83_v9 = vld [vmem:[#allocation2] sm:$0xff]  ;;  %v1189_v15 = vld [vmem:[#allocation6 + $0x2] ss:$0 sm:$0xff]  ;;  %v1190_v21 = vld [vmem:[#allocation6 + $0x3] ss:$0 sm:$0xff] }
  0x19   :  { %234 = vmatpush.msrb.mxu1 %v90_v5  ;;  %274 = vmatpush.msrb.mxu3 %v92_v6 }
  0x1a   :  { %132 = vmatpush.msra.mxu0 %v85_v2  ;;  %175 = vmatpush.msra.mxu2 %v87_v3 }
  0x1b   :  { %235 = vmatpush.msrb.mxu1 %v89_v7  ;;  %275 = vmatpush.msrb.mxu3 %v91_v8 }
  0x1c   :  { %1122 = vmatmul.msk.f32.vlgmr.msra.gmra.mxu0 %vm113_vm0, %v83_v9  ;;  %1124 = vmatmul.msk.f32.vlgmr.msra.gmra.mxu2 %vm113_vm0, %v83_v9 }
  0x1d   :  { %214 = vmatpush.msrb.mxu0 %v90_v5  ;;  %254 = vmatpush.msrb.mxu2 %v92_v6 }
  0x1f   :  { %215 = vmatpush.msrb.mxu0 %v89_v7  ;;  %255 = vmatpush.msrb.mxu2 %v91_v8 }
  0x20   :  { %1127 = vmatmul.msk.f32.vlgmr.msrb.gmra.mxu1 %vm113_vm0, %v84_v4  ;;  %1129 = vmatmul.msk.f32.vlgmr.msrb.gmra.mxu3 %vm113_vm0, %v84_v4 }
  0x24   :  { %1126 = vmatmul.msk.f32.vlgmr.msrb.gmra.mxu0 %vm113_vm0, %v83_v9  ;;  %1128 = vmatmul.msk.f32.vlgmr.msrb.gmra.mxu2 %vm113_vm0, %v83_v9 }
  0x95   :  { %v157_v11 = vpop.f32.mrf.mxu1 }
  0x96   :  { %v1389_v12 = vadd.f32 %v1187_v10, %v157_v11 }
  0x98   :  { %318 = vrot.lane.b32.xlu1 %v1389_v12, %s1334_s2  ;;  %v281_v37 = vmul.f32 0.35355338, %v1389_v12 }
  0x99   :  { %v134_v14 = vpop.f32.mrf.mxu0 }
  0x9a   :  { %v1413_v31 = vadd.f32 %v1187_v10, %v134_v14 }
  0x9b   :  { %v197_v16 = vpop.f32.mrf.mxu3 }
  0x9c   :  { %v1392_v17 = vadd.f32 %v1188_v13, %v197_v16  ;;  %v280_v46 = vmul.f32 0.35355338, %v1413_v31 }
  0x9d   :  { %v237_v18 = vpop.f32.mrf.mxu1 }
  0x9e   :  { %v1394_v19 = vadd.f32 %v1189_v15, %v237_v18  ;;  %374 = vrot.lane.b32.xlu0 %v1392_v17, %s1334_s2  ;;  %v283_v39 = vmul.f32 0.35355338, %v1392_v17 }
  0x9f   :  { %v177_v20 = vpop.f32.mrf.mxu2 }
  0xa0   :  { %430 = vrot.lane.b32.xlu1 %v1394_v19, %s1334_s2  ;;  %v1398_v22 = vadd.f32 %v1188_v13, %v177_v20  ;;  %v1177_v23 = vpack.i.bf16 %v1394_v19, %v1389_v12  ;;  %v285_v41 = vmul.f32 0.35355338, %v1394_v19 }
  0xa1   :  { %v217_v24 = vpop.f32.mrf.mxu0 }
  0xa2   :  { %346 = vrot.lane.b32.xlu2 %v1398_v22, %s1334_s2  ;;  %v1405_v27 = vadd.f32 %v1189_v15, %v217_v24  ;;  %v282_v32 = vmul.f32 0.35355338, %v1398_v22 }
  0xa3   :  { %v277_v25 = vpop.f32.mrf.mxu3 }
  0xa4   :  { %v1403_v26 = vadd.f32 %v1190_v21, %v277_v25  ;;  %v284_v47 = vmul.f32 0.35355338, %v1405_v27 }
  0xa6   :  { %486 = vrot.lane.b32.xlu0 %v1403_v26, %s1334_s2  ;;  %v1172_v28 = vpack.i.bf16 %v1403_v26, %v1392_v17  ;;  %v287_v43 = vmul.f32 0.35355338, %v1403_v26 }
  0xa7   :  { %v257_v29 = vpop.f32.mrf.mxu2 }
  0xa8   :  { %402 = vrot.lane.b32.xlu1 %v1405_v27, %s1334_s2  ;;  %v1411_v30 = vadd.f32 %v1190_v21, %v257_v29 }
  0xaa   :  { %458 = vrot.lane.b32.xlu2 %v1411_v30, %s1334_s2  ;;  %v286_v34 = vmul.f32 0.35355338, %v1411_v30 }
  0xae   :  { %289 = vrot.lane.b32.xlu0 %v1413_v31, %s1334_s2 }
  0xfc   :  { %v347_v33 = vpop.permute.xlu2 %346 }
  0xfd   :  { %1134 = vmatpush.xpose.msk.msra.mxu2 %vm291_vm1, %v347_v33 }
 0x100   :  { %1135 = vmatmul.msk.f32.vlgmr.msra.gmra.mxu2 %vm291_vm1, %v282_v32 }
 0x104   :  { %v459_v35 = vpop.permute.xlu2 %458 }
 0x105   :  { %1142 = vmatpush.xpose.msk.msrb.mxu2 %vm291_vm1, %v459_v35 }
 0x108   :  { %1143 = vmatmul.msk.f32.vlgmr.msrb.gmra.mxu2 %vm291_vm1, %v286_v34 }
 0x10a   :  { %v319_v36 = vpop.permute.xlu1 %318 }
 0x10b   :  { %1132 = vmatpush.xpose.msk.msra.mxu1 %vm291_vm1, %v319_v36 }
 0x10e   :  { %1133 = vmatmul.msk.f32.vlgmr.msra.gmra.mxu1 %vm291_vm1, %v281_v37 }
 0x110   :  { %v375_v38 = vpop.permute.xlu0 %374 }
 0x111   :  { %1136 = vmatpush.xpose.msk.msra.mxu3 %vm291_vm1, %v375_v38 }
 0x112   :  { %v431_v40 = vpop.permute.xlu1 %430 }
 0x113   :  { %1140 = vmatpush.xpose.msk.msrb.mxu1 %vm291_vm1, %v431_v40 }
 0x114   :  { %1137 = vmatmul.msk.f32.vlgmr.msra.gmra.mxu3 %vm291_vm1, %v283_v39 }
 0x116   :  { %1141 = vmatmul.msk.f32.vlgmr.msrb.gmra.mxu1 %vm291_vm1, %v285_v41 }
 0x118   :  { %v487_v42 = vpop.permute.xlu0 %486 }
 0x119   :  { %1144 = vmatpush.xpose.msk.msrb.mxu3 %vm291_vm1, %v487_v42 }
 0x11a   :  { %v403_v44 = vpop.permute.xlu1 %402 }
 0x11c   :  { %1145 = vmatmul.msk.f32.vlgmr.msrb.gmra.mxu3 %vm291_vm1, %v287_v43 }
 0x120   :  { %v290_v45 = vpop.permute.xlu0 %289 }
 0x121   :  { %1130 = vmatpush.xpose.msk.msra.mxu0 %vm291_vm1, %v290_v45 }
 0x124   :  { %1131 = vmatmul.msk.f32.vlgmr.msra.gmra.mxu0 %vm291_vm1, %v280_v46  ;;  %v1182_v46 = vpack.i.bf16 %v1413_v31, %v1411_v30 }
 0x125   :  { %1138 = vmatpush.xpose.msk.msrb.mxu0 %vm291_vm1, %v403_v44 }
 0x12c   :  { %1139 = vmatmul.msk.f32.vlgmr.msrb.gmra.mxu0 %vm291_vm1, %v284_v47 }
 0x183   :  { %v370_v58 = vpop.f32.mrf.mxu2 }
 0x184   :  { %v519_v59 = vsel %vm291_vm1, %v370_v58, -inf }
 0x18b   :  { %v342_v48 = vpop.f32.mrf.mxu1  ;;  %v482_v62 = vpop.f32.mrf.mxu2 }
 0x18c   :  { %v516_v49 = vsel %vm291_vm1, %v342_v48, -inf  ;;  %v531_v63 = vsel %vm291_vm1, %v482_v62, -inf }
 0x18d   :  { %517 = vmax.xlane.f32.xlu1 %v516_v49 }
 0x193   :  { %v454_v52 = vpop.f32.mrf.mxu1 }
 0x194   :  { %v528_v54 = vsel %vm291_vm1, %v454_v52, -inf }
 0x197   :  { %v398_v50 = vpop.f32.mrf.mxu3 }
 0x198   :  { %v522_v51 = vsel %vm291_vm1, %v398_v50, -inf }
 0x199   :  { %523 = vmax.xlane.f32.xlu2 %v522_v51 }
 0x19f   :  { %v510_v53 = vpop.f32.mrf.mxu3 }
 0x1a0   :  { %v534_v55 = vsel %vm291_vm1, %v510_v53, -inf }
 0x1a1   :  { %529 = vmax.xlane.f32.xlu2 %v528_v54  ;;  %535 = vmax.xlane.f32.xlu0 %v534_v55  ;;  %v314_v56 = vpop.f32.mrf.mxu0 }
 0x1a2   :  { %v513_v57 = vsel %vm291_vm1, %v314_v56, -inf }
 0x1a3   :  { %514 = vmax.xlane.f32.xlu1 %v513_v57 }
 0x1a9   :  { %520 = vmax.xlane.f32.xlu2 %v519_v59  ;;  %v1447_v60 = vpop.f32.mrf.mxu0 }
 0x1aa   :  { %v525_v61 = vsel %vm291_vm1, %v1447_v60, -inf }
 0x1ab   :  { %526 = vmax.xlane.f32.xlu0 %v525_v61 }
 0x1b3   :  { %532 = vmax.xlane.f32.xlu0 %v531_v63 }
 0x200   :  { %v518_v0 = vpop.xlane.xlu1 %517 }
 0x201   :  { %v538_v1 = vsub.f32 %v342_v48, %v518_v0 }
 0x203   :  { %v547_v2 = vmul.f32 1.442695, %v538_v1 }
 0x205   :  { %1192 = vpow2.f32 %v547_v2 }
 0x20b   :  { %v1452_v3 = vpop.eup %1192 }
 0x20c   :  { %v524_v4 = vpop.xlane.xlu2 %523  ;;  %v564_v5 = vsel %vm291_vm1, %v1452_v3, 0.0 }
 0x20d   :  { %v540_v6 = vsub.f32 %v398_v50, %v524_v4  ;;  %565 = vadd.xlane.f32.xlu2 %v564_v5 }
 0x20f   :  { %v551_v7 = vmul.f32 1.442695, %v540_v6 }
 0x211   :  { %1194 = vpow2.f32 %v551_v7 }
 0x214   :  { %v530_v8 = vpop.xlane.xlu2 %529  ;;  %v536_v9 = vpop.xlane.xlu0 %535 }
 0x215   :  { %v542_v10 = vsub.f32 %v454_v52, %v530_v8  ;;  %v544_v11 = vsub.f32 %v510_v53, %v536_v9 }
 0x216   :  { %v515_v18 = vpop.xlane.xlu1 %514 }
 0x217   :  { %v1456_v13 = vpop.eup %1194  ;;  %v555_v14 = vmul.f32 1.442695, %v542_v10  ;;  %v559_v15 = vmul.f32 1.442695, %v544_v11  ;;  %v537_v29 = vsub.f32 %v314_v56, %v515_v18 }
 0x218   :  { %v570_v16 = vsel %vm291_vm1, %v1456_v13, 0.0 }
 0x219   :  { %1196 = vpow2.f32 %v555_v14  ;;  %571 = vadd.xlane.f32.xlu2 %v570_v16  ;;  %v545_v36 = vmul.f32 1.442695, %v537_v29 }
 0x21a   :  { %1198 = vpow2.f32 %v559_v15 }
 0x21c   :  { %v521_v20 = vpop.xlane.xlu2 %520 }
 0x21d   :  { %v539_v21 = vsub.f32 %v370_v58, %v521_v20 }
 0x21e   :  { %v527_v24 = vpop.xlane.xlu0 %526 }
 0x21f   :  { %v1460_v25 = vpop.eup %1196  ;;  %v549_v32 = vmul.f32 1.442695, %v539_v21  ;;  %v541_v12 = vsub.f32 %v1447_v60, %v527_v24 }
 0x220   :  { %v1462_v33 = vpop.eup %1198  ;;  %v576_v34 = vsel %vm291_vm1, %v1460_v25, 0.0 }
 0x221   :  { %1200 = vpow2.f32 %v549_v32  ;;  %v582_v35 = vsel %vm291_vm1, %v1462_v33, 0.0  ;;  %577 = vadd.xlane.f32.xlu0 %v576_v34  ;;  %v553_v19 = vmul.f32 1.442695, %v541_v12 }
 0x222   :  { %583 = vadd.xlane.f32.xlu1 %v582_v35  ;;  %1202 = vpow2.f32 %v545_v36 }
 0x226   :  { %v533_v37 = vpop.xlane.xlu0 %532 }
 0x227   :  { %v1468_v38 = vpop.eup %1200  ;;  %v543_v39 = vsub.f32 %v482_v62, %v533_v37 }
 0x228   :  { %v567_v40 = vsel %vm291_vm1, %v1468_v38, 0.0  ;;  %v1472_v42 = vpop.eup %1202 }
 0x229   :  { %568 = vadd.xlane.f32.xlu0 %v567_v40  ;;  %v557_v41 = vmul.f32 1.442695, %v543_v39  ;;  %v561_v43 = vsel %vm291_vm1, %v1472_v42, 0.0 }
 0x22b   :  { %1204 = vpow2.f32 %v557_v41 }
 0x22c   :  { %1206 = vpow2.f32 %v553_v19 }
 0x231   :  { %1178 = vrot.lane.b32.xlu2 %v1177_v23, %s1335_s3  ;;  %562 = vadd.xlane.f32.xlu0 %v561_v43  ;;  %v1479_v44 = vpop.eup %1204 }
 0x232   :  { %v579_v45 = vsel %vm291_vm1, %v1479_v44, 0.0  ;;  %v1491_v23 = vpop.eup %1206 }
 0x239   :  { %757 = vrot.lane.b32.xlu2 %v1398_v22, %s1335_s3  ;;  %580 = vadd.xlane.f32.xlu0 %v579_v45  ;;  %v573_v22 = vsel %vm291_vm1, %v1491_v23, 0.0 }
 0x23b   :  { %1173 = vrot.lane.b32.xlu1 %v1172_v28, %s1335_s3 }
 0x241   :  { %809 = vrot.lane.b32.xlu2 %v1405_v27, %s1335_s3 }
 0x24d   :  { %1183 = vrot.lane.b32.xlu0 %v1182_v46, %s1335_s3 }
 0x265   :  { %574 = vadd.xlane.f32.xlu1 %v573_v22 }
 0x280   :  { %v566_v47 = vpop.xlane.xlu2 %565 }
 0x281   :  { %1208 = vrcp.f32 %v566_v47  ;;  %v610_v30 = vand.u32 2147483648, %v566_v47  ;;  %vm604_vm3 = vweird.f32 %v566_v47  ;;  %v608_v49 = vand.u32 2147483647, %v566_v47 }
 0x283   :  { %v611_v51 = vor.u32 1.1754944e-38, %v610_v30  ;;  %vm609_vm5 = vcmp.eq.f32.partialorder %v608_v49, 8.507059e+37 }
 0x287   :  { %v1209_v17 = vpop.eup %1208 }
 0x288   :  { %v600_v26 = vmul.f32 %v1209_v17, %v566_v47  ;;  %vm605_vm2 = vweird.f32 %v1209_v17 }
 0x289   :  { %vm606_vm4 = vmor %vm604_vm3, %vm605_vm2 }
 0x28a   :  { %v601_v28 = vsub.f32 1.0, %v600_v26 }
 0x28c   :  { %v602_v27 = vmul.f32 %v1209_v17, %v601_v28  ;;  %v1495_v48 = vpop.xlane.xlu2 %571 }
 0x28d   :  { %1210 = vrcp.f32 %v1495_v48  ;;  %v638_v24 = vand.u32 2147483648, %v1495_v48  ;;  %vm632_vm11 = vweird.f32 %v1495_v48  ;;  %v636_v32 = vand.u32 2147483647, %v1495_v48 }
 0x28e   :  { %v603_v31 = vadd.f32 %v1209_v17, %v602_v27 }
 0x28f   :  { %v639_v41 = vor.u32 1.1754944e-38, %v638_v24  ;;  %vm637_vm15 = vcmp.eq.f32.partialorder %v636_v32, 8.507059e+37 }
 0x290   :  { %v607_v50 = vsel %vm606_vm4, %v1209_v17, %v603_v31 }
 0x291   :  { %v612_v52 = vsel %vm609_vm5, %v611_v51, %v607_v50 }
 0x292   :  { %v698_v59 = vmul.f32 %v1452_v3, %v612_v52 }
 0x293   :  { %v1211_v58 = vpop.eup %1210 }
 0x294   :  { %v1179_v53 = vpop.permute.xlu2 %1178  ;;  %v578_v54 = vpop.xlane.xlu0 %577  ;;  %v628_v60 = vmul.f32 %v1211_v58, %v1495_v48  ;;  %vm633_vm9 = vweird.f32 %v1211_v58 }
 0x295   :  { %v1181_v55 = vunpack.i.h.bf16 %v1179_v53  ;;  %v1180_v56 = vunpack.i.l.bf16 %v1179_v53  ;;  %v1498_v57 = vpop.xlane.xlu1 %583  ;;  %1212 = vrcp.f32 %v578_v54  ;;  %v666_v5 = vand.u32 2147483648, %v578_v54  ;;  %vm634_vm12 = vmor %vm632_vm11, %vm633_vm9 }
 0x296   :  { %1214 = vrcp.f32 %v1498_v57  ;;  %v629_v1 = vsub.f32 1.0, %v628_v60  ;;  %v664_v6 = vand.u32 2147483647, %v578_v54  ;;  %vm660_vm7 = vweird.f32 %v578_v54 }
 0x297   :  { %752 = vmatpush.msra.mxu1 %v1180_v56  ;;  %v667_v11 = vor.u32 1.1754944e-38, %v666_v5  ;;  %vm688_vm5 = vweird.f32 %v1498_v57  ;;  %v694_v28 = vand.u32 2147483648, %v1498_v57  ;;  %v692_v30 = vand.u32 2147483647, %v1498_v57 }
 0x298   :  { %1147 = vmatmul.msk.f32.vlgmr.msra.gmra.mxu1 %vm291_vm1, %v698_v59  ;;  %v630_v7 = vmul.f32 %v1211_v58, %v629_v1  ;;  %vm665_vm10 = vcmp.eq.f32.partialorder %v664_v6, 8.507059e+37 }
 0x299   :  { %856 = vmatpush.msrb.mxu1 %v1181_v55  ;;  %v695_v52 = vor.u32 1.1754944e-38, %v694_v28 }
 0x29a   :  { %v631_v18 = vadd.f32 %v1211_v58, %v630_v7 }
 0x29b   :  { %v1213_v61 = vpop.eup %1212 }
 0x29c   :  { %v656_v62 = vmul.f32 %v1213_v61, %v578_v54  ;;  %v758_v63 = vpop.permute.xlu2 %757  ;;  %v569_v0 = vpop.xlane.xlu0 %568  ;;  %vm661_vm6 = vweird.f32 %v1213_v61  ;;  %v635_v39 = vsel %vm634_vm12, %v1211_v58, %v631_v18 }
 0x29d   :  { %1216 = vrcp.f32 %v569_v0  ;;  %778 = vmatpush.msra.mxu2 %v758_v63  ;;  %v1504_v2 = vpop.eup %1214  ;;  %vm662_vm8 = vmor %vm660_vm7, %vm661_vm6  ;;  %v624_v34 = vand.u32 2147483648, %v569_v0  ;;  %v622_v37 = vand.u32 2147483647, %v569_v0  ;;  %vm618_vm14 = vweird.f32 %v569_v0 }
 0x29e   :  { %v657_v4 = vsub.f32 1.0, %v656_v62  ;;  %v684_v8 = vmul.f32 %v1504_v2, %v1498_v57  ;;  %v640_v12 = vsel %vm637_vm15, %v639_v41, %v635_v39  ;;  %vm689_vm4 = vweird.f32 %v1504_v2  ;;  %v100_v39 = vld [vmem:[#allocation7 + $0x18] sm:$0xff] }
 0x29f   :  { %v625_v46 = vor.u32 1.1754944e-38, %v624_v34  ;;  %vm623_vm3 = vcmp.eq.f32.partialorder %v622_v37, 8.507059e+37  ;;  %v700_v50 = vmul.f32 %v1456_v13, %v640_v12  ;;  %vm690_vm6 = vmor %vm688_vm5, %vm689_vm4  ;;  %vm693_vm7 = vcmp.eq.f32.partialorder %v692_v30, 8.507059e+37  ;;  %v97_v34 = vld [vmem:[#allocation7] sm:$0xff] }
 0x2a0   :  { %v658_v3 = vmul.f32 %v1213_v61, %v657_v4  ;;  %v685_v20 = vsub.f32 1.0, %v684_v8  ;;  %954 = vmatpush.msra.mxu1 %v97_v34 }
 0x2a2   :  { %v659_v9 = vadd.f32 %v1213_v61, %v658_v3  ;;  %v686_v40 = vmul.f32 %v1504_v2, %v685_v20 }
 0x2a3   :  { %v1217_v10 = vpop.eup %1216 }
 0x2a4   :  { %v663_v14 = vsel %vm662_vm8, %v1213_v61, %v659_v9  ;;  %v614_v15 = vmul.f32 %v1217_v10, %v569_v0  ;;  %v1508_v16 = vpop.xlane.xlu0 %562  ;;  %vm619_vm13 = vweird.f32 %v1217_v10  ;;  %v687_v47 = vadd.f32 %v1504_v2, %v686_v40 }
 0x2a5   :  { %v668_v21 = vsel %vm665_vm10, %v667_v11, %v663_v14  ;;  %1218 = vrcp.f32 %v1508_v16  ;;  %vm620_vm2 = vmor %vm618_vm14, %vm619_vm13  ;;  %vm590_vm10 = vweird.f32 %v1508_v16  ;;  %v594_v61 = vand.u32 2147483647, %v1508_v16 }
 0x2a6   :  { %v615_v29 = vsub.f32 1.0, %v614_v15  ;;  %v702_v35 = vmul.f32 %v1460_v25, %v668_v21  ;;  %v691_v51 = vsel %vm690_vm6, %v1504_v2, %v687_v47 }
 0x2a7   :  { %v696_v55 = vsel %vm693_vm7, %v695_v52, %v691_v51  ;;  %vm595_vm14 = vcmp.eq.f32.partialorder %v594_v61, 8.507059e+37 }
 0x2a8   :  { %v616_v36 = vmul.f32 %v1217_v10, %v615_v29  ;;  %1151 = vmatmul.msk.f32.vlgmr.msrb.gmra.mxu1 %vm291_vm1, %v702_v35  ;;  %v704_v13 = vmul.f32 %v1462_v33, %v696_v55  ;;  %v99_v35 = vld [vmem:[#allocation7 + $0x10] sm:$0xff] }
 0x2a9   :  { %1046 = vmatpush.msrb.mxu1 %v99_v35 }
 0x2aa   :  { %v617_v43 = vadd.f32 %v1217_v10, %v616_v36  ;;  %v98_v36 = vld [vmem:[#allocation7 + $0x8] sm:$0xff] }
 0x2ab   :  { %v1219_v45 = vpop.eup %1218 }
 0x2ac   :  { %v621_v19 = vsel %vm620_vm2, %v1217_v10, %v617_v43  ;;  %v586_v25 = vmul.f32 %v1219_v45, %v1508_v16  ;;  %v581_v22 = vpop.xlane.xlu0 %580  ;;  %vm591_vm8 = vweird.f32 %v1219_v45  ;;  %v810_v10 = vpop.permute.xlu2 %809 }
 0x2ad   :  { %v626_v17 = vsel %vm623_vm3, %v625_v46, %v621_v19  ;;  %v1174_v26 = vpop.permute.xlu1 %1173  ;;  %1220 = vrcp.f32 %v581_v22  ;;  %v680_v60 = vand.u32 2147483648, %v581_v22  ;;  %v678_v62 = vand.u32 2147483647, %v581_v22  ;;  %vm592_vm11 = vmor %vm590_vm10, %vm591_vm8 }
 0x2ae   :  { %v1176_v27 = vunpack.i.h.bf16 %v1174_v26  ;;  %v1175_v48 = vunpack.i.l.bf16 %v1174_v26  ;;  %v587_v31 = vsub.f32 1.0, %v586_v25  ;;  %v699_v49 = vmul.f32 %v1468_v38, %v626_v17  ;;  %v1191_v26 = vld [vmem:[%s1561_s4] ss:$0 sm:$0xff] }
 0x2af   :  { %v596_v38 = vand.u32 2147483648, %v1508_v16  ;;  %vm674_vm12 = vweird.f32 %v581_v22  ;;  %v681_v33 = vor.u32 1.1754944e-38, %v680_v60  ;;  %vm679_vm15 = vcmp.eq.f32.partialorder %v678_v62, 8.507059e+37 }
 0x2b0   :  { %804 = vmatpush.msra.mxu3 %v1175_v48  ;;  %1148 = vmatmul.msk.f32.vlgmr.msra.gmra.mxu2 %vm291_vm1, %v699_v49  ;;  %v588_v54 = vmul.f32 %v1219_v45, %v587_v31 }
 0x2b1   :  { %1149 = vmatmul.msk.f32.vlgmr.msra.gmra.mxu3 %vm291_vm1, %v700_v50  ;;  %v597_v1 = vor.u32 1.1754944e-38, %v596_v38 }
 0x2b2   :  { %908 = vmatpush.msrb.mxu3 %v1176_v27  ;;  %v589_v58 = vadd.f32 %v1219_v45, %v588_v54 }
 0x2b3   :  { %v1221_v53 = vpop.eup %1220 }
 0x2b4   :  { %v670_v56 = vmul.f32 %v1221_v53, %v581_v22  ;;  %vm675_vm9 = vweird.f32 %v1221_v53  ;;  %v593_v0 = vsel %vm592_vm11, %v1219_v45, %v589_v58  ;;  %1000 = vmatpush.msra.mxu3 %v98_v36 }
 0x2b5   :  { %vm676_vm13 = vmor %vm674_vm12, %vm675_vm9  ;;  %v598_v4 = vsel %vm595_vm14, %v597_v1, %v593_v0 }
 0x2b6   :  { %v671_v57 = vsub.f32 1.0, %v670_v56  ;;  %v697_v8 = vmul.f32 %v1472_v42, %v598_v4 }
 0x2b8   :  { %v672_v59 = vmul.f32 %v1221_v53, %v671_v57 }
 0x2b9   :  { %1153 = vmatmul.msk.f32.vlgmr.msrb.gmra.mxu3 %vm291_vm1, %v704_v13 }
 0x2ba   :  { %v673_v63 = vadd.f32 %v1221_v53, %v672_v59  ;;  %1092 = vmatpush.msrb.mxu3 %v100_v39 }
 0x2bc   :  { %v677_v2 = vsel %vm676_vm13, %v1221_v53, %v673_v63 }
 0x2bd   :  { %v682_v5 = vsel %vm679_vm15, %v681_v33, %v677_v2 }
 0x2be   :  { %v703_v9 = vmul.f32 %v1479_v44, %v682_v5 }
 0x2bf   :  { %v1184_v3 = vpop.permute.xlu0 %1183 }
 0x2c0   :  { %v1186_v6 = vunpack.i.h.bf16 %v1184_v3  ;;  %v1185_v7 = vunpack.i.l.bf16 %v1184_v3 }
 0x2c2   :  { %726 = vmatpush.msra.mxu0 %v1186_v6  ;;  %882 = vmatpush.msrb.mxu2 %v1185_v7 }
 0x2c3   :  { %1146 = vmatmul.msk.f32.vlgmr.msra.gmra.mxu0 %vm291_vm1, %v697_v8  ;;  %1152 = vmatmul.msk.f32.vlgmr.msrb.gmra.mxu2 %vm291_vm1, %v703_v9 }
 0x2c4   :  { %830 = vmatpush.msrb.mxu0 %v810_v10  ;;  %977 = vmatpush.msra.mxu2 %v98_v36 }
 0x2c6   :  { %931 = vmatpush.msra.mxu0 %v97_v34  ;;  %1069 = vmatpush.msrb.mxu2 %v100_v39 }
 0x2d8   :  { %v575_v11 = vpop.xlane.xlu1 %574 }
 0x2d9   :  { %1222 = vrcp.f32 %v575_v11  ;;  %v652_v18 = vand.u32 2147483648, %v575_v11  ;;  %v650_v21 = vand.u32 2147483647, %v575_v11  ;;  %vm646_vm3 = vweird.f32 %v575_v11 }
 0x2db   :  { %v653_v44 = vor.u32 1.1754944e-38, %v652_v18  ;;  %vm651_vm5 = vcmp.eq.f32.partialorder %v650_v21, 8.507059e+37 }
 0x2df   :  { %v1223_v14 = vpop.eup %1222 }
 0x2e0   :  { %v642_v15 = vmul.f32 %v1223_v14, %v575_v11  ;;  %vm647_vm2 = vweird.f32 %v1223_v14 }
 0x2e1   :  { %vm648_vm4 = vmor %vm646_vm3, %vm647_vm2 }
 0x2e2   :  { %v643_v16 = vsub.f32 1.0, %v642_v15 }
 0x2e4   :  { %v644_v20 = vmul.f32 %v1223_v14, %v643_v16 }
 0x2e6   :  { %v645_v42 = vadd.f32 %v1223_v14, %v644_v20 }
 0x2e8   :  { %v649_v24 = vsel %vm648_vm4, %v1223_v14, %v645_v42 }
 0x2e9   :  { %v654_v29 = vsel %vm651_vm5, %v653_v44, %v649_v24 }
 0x2ea   :  { %v701_v32 = vmul.f32 %v1491_v23, %v654_v29 }
 0x2ec   :  { %1150 = vmatmul.msk.f32.vlgmr.msrb.gmra.mxu0 %vm291_vm1, %v701_v32 }
 0x2ed   :  { %1023 = vmatpush.msrb.mxu0 %v99_v35 }
 0x315   :  { %v754_v37 = vpop.f32.mrf.mxu1 }
 0x316   :  { %1155 = vmatmul.msk.f32.vlgmr.msra.gmra.mxu1 %vm291_vm1, %v754_v37 }
 0x325   :  { %v858_v40 = vpop.f32.mrf.mxu1 }
 0x326   :  { %1159 = vmatmul.msk.f32.vlgmr.msrb.gmra.mxu1 %vm291_vm1, %v858_v40 }
 0x333   :  { %v780_v23 = vpop.f32.mrf.mxu2 }
 0x334   :  { %v806_v41 = vpop.f32.mrf.mxu3  ;;  %1156 = vmatmul.msk.f32.vlgmr.msra.gmra.mxu2 %vm291_vm1, %v780_v23 }
 0x335   :  { %1157 = vmatmul.msk.f32.vlgmr.msra.gmra.mxu3 %vm291_vm1, %v806_v41 }
 0x33c   :  { %v910_v43 = vpop.f32.mrf.mxu3 }
 0x33d   :  { %1161 = vmatmul.msk.f32.vlgmr.msrb.gmra.mxu3 %vm291_vm1, %v910_v43 }
 0x340   :  { %v728_v45 = vpop.f32.mrf.mxu0 }
 0x341   :  { %1154 = vmatmul.msk.f32.vlgmr.msra.gmra.mxu0 %vm291_vm1, %v728_v45 }
 0x346   :  { %v884_v46 = vpop.f32.mrf.mxu2 }
 0x347   :  { %1160 = vmatmul.msk.f32.vlgmr.msrb.gmra.mxu2 %vm291_vm1, %v884_v46 }
 0x369   :  { %v832_v12 = vpop.f32.mrf.mxu0 }
 0x36a   :  { %1158 = vmatmul.msk.f32.vlgmr.msrb.gmra.mxu0 %vm291_vm1, %v832_v12 }
 0x393   :  { %v956_v19 = vpop.f32.mrf.mxu1 }
 0x3a3   :  { %v1048_v47 = vpop.f32.mrf.mxu1 }
 0x3b7   :  { %v979_v31 = vpop.f32.mrf.mxu2 }
 0x3b8   :  { %v1002_v25 = vpop.f32.mrf.mxu3 }
 0x3b9   :  { %v1098_v22 = vadd.f32 %v1002_v25, %v956_v19 }
 0x3bb   :  { %v1100_v17 = vadd.f32 %v1098_v22, %v1048_v47 }
 0x3be   :  { %v933_v30 = vpop.f32.mrf.mxu0 }
 0x3bf   :  { %v1097_v50 = vadd.f32 %v979_v31, %v933_v30 }
 0x3c0   :  { %v1094_v28 = vpop.f32.mrf.mxu3 }
 0x3c1   :  { %v1102_v27 = vadd.f32 %v1100_v17, %v1094_v28 }
 0x3c3   :  { %v1108_v48 = vadd.f32 %v1191_v26, %v1102_v27 }
 0x3c5   :  { %1110 = vrot.lane.b32.xlu2 %v1108_v48, %s1328_s27 }
 0x3ca   :  { %v1071_v52 = vpop.f32.mrf.mxu2 }
 0x3e7   :  { %v1025_v49 = vpop.f32.mrf.mxu0 }
 0x3e8   :  { %v1099_v51 = vadd.f32 %v1097_v50, %v1025_v49 }
 0x3ea   :  { %v1101_v53 = vadd.f32 %v1099_v51, %v1071_v52 }
 0x3ec   :  { %v1107_v54 = vadd.f32 %v1191_v26, %v1101_v53 }
 0x41f   :  { %v1111_v55 = vpop.permute.xlu2 %1110 }
 0x420   :  { %v1113_v56 = vsel %vm291_vm1, %v1107_v54, %v1111_v55 }
 0x421   :  { %1114 = vst.msk [vmem:[%s1562_s5] sm:$0xff] %vm113_vm0, %v1113_v56 }
 0x422   :  { %1119 = vsyncpa [#allocation3], 1 }
 0x423   :  { %1120 = vsyncpa [#allocation5], 1 }
 0x424   :  { %1121 = vsyncpa [#allocation8], 1 }

</bundles_post_ra>
